<compile_context>
chip_gen: v7x
topology: tpu7x:2x2x1
jax: 0.10.0
libtpu: 0.0.40
codegen_flags: <defaults>
</compile_context>

<pallas_src>
import functools

import jax
import jax.numpy as jnp
from jax.experimental import pallas as pl
from jax.experimental.pallas import tpu as pltpu

LANE = 128  # TPU lane width; every matmul dim is padded to a multiple of this.


def _round_up(n, m):
    return ((n + m - 1) // m) * m


def actor_critic_kernel(x_ref, wfc_ref, wh_ref, out_ref, *, num_actions):
    """Fused forward. Shapes (all lane/sublane aligned):
         x_ref   (B_pad, obs_pad)      activations (f32 or bf16), bias col folded in
         wfc_ref (obs_pad, hidden_pad) fc weights + fc bias row + ones-carrier
         wh_ref  (hidden_pad, P)       fused actor|critic weights + bias row
         out_ref (B_pad, P) f32:
           cols [0, num_actions)  -> softmax probabilities
           col  num_actions       -> critic value
           remaining cols         -> zeros (lane padding)
    """
    dt = wfc_ref.dtype  # MXU operand dtype (f32 or bf16); accumulation is f32.

    # fc (+ folded bias) + relu.  Padded rows/cols of wfc are zero except the
    # ones-carrier, so h[:, hidden_dim] == 1.0 and other padded cols are 0.
    h = jnp.dot(x_ref[...], wfc_ref[...], preferred_element_type=jnp.float32)
    h = jnp.maximum(h, 0.0)  # f32 VPU math (v5e has no bf16 VPU)

    # Fused actor+critic head (+ folded biases): one lane-dense MXU matmul.
    z = jnp.dot(h.astype(dt), wh_ref[...], preferred_element_type=jnp.float32)

    col = jax.lax.broadcasted_iota(jnp.int32, z.shape, dimension=1)
    actor_mask = col < num_actions
    neg_inf = jnp.float32(-jnp.inf)

    # Numerically-stable softmax restricted to the real action columns.
    logits = jnp.where(actor_mask, z, neg_inf)
    m = jnp.max(logits, axis=-1, keepdims=True)
    e = jnp.exp(jnp.where(actor_mask, z - m, neg_inf))  # exp(-inf) == 0 exactly
    denom = jnp.sum(e, axis=-1, keepdims=True)
    probs = e * pl.reciprocal(denom, approx=False)  # approx=True breaks 1e-5 check

    value_mask = col == num_actions
    out_ref[...] = jnp.where(actor_mask, probs,
                             jnp.where(value_mask, z, 0.0)).astype(out_ref.dtype)


def prepare_params(params, *, use_bf16=False):
    """One-time conversion from PyTorch-convention params to kernel layout.

    Runs at init / param-load time, NOT on the per-call hot path:
      - transpose (out, in) -> (in, out),
      - fold biases into the weights (ones column in x / ones-carrier in h),
      - fuse actor + critic into one head,
      - zero-pad every matmul dim to a multiple of 128 lanes,
      - optionally cast weights to bf16 (MXU-native on v5e/v6e/v7x; accumulation
        stays f32 in the kernel).
    """
    hidden_dim, obs_dim = params["fc_w"].shape
    num_actions = params["actor_w"].shape[0]

    obs_pad = _round_up(obs_dim + 1, LANE)      # +1: ones column of x (fc bias)
    hidden_pad = _round_up(hidden_dim + 1, LANE)  # +1: ones-carrier (head bias)
    P = _round_up(num_actions + 1, LANE)        # +1: critic column
    # TODO(synk): on v6e at production hidden_dim, pad contraction tiles to 256
    # (2x256x256 MXU); 128 alignment is sufficient for v5e.

    w_fc = jnp.zeros((obs_pad, hidden_pad), jnp.float32)
    w_fc = w_fc.at[:obs_dim, :hidden_dim].set(params["fc_w"].T)
    w_fc = w_fc.at[obs_dim, :hidden_dim].set(params["fc_b"])   # fc bias row
    w_fc = w_fc.at[obs_dim, hidden_dim].set(1.0)               # ones-carrier

    w_head = jnp.zeros((hidden_pad, P), jnp.float32)
    w_head = w_head.at[:hidden_dim, :num_actions].set(params["actor_w"].T)
    w_head = w_head.at[:hidden_dim, num_actions].set(params["critic_w"][0])
    w_head = w_head.at[hidden_dim, :num_actions].set(params["actor_b"])
    w_head = w_head.at[hidden_dim, num_actions].set(params["critic_b"][0])

    dt = jnp.bfloat16 if use_bf16 else jnp.float32
    return {
        "w_fc": w_fc.astype(dt),
        "w_head": w_head.astype(dt),
        "num_actions": int(num_actions),
    }


@functools.partial(jax.jit, static_argnames=("num_actions",))
def _forward(x, w_fc, w_head, *, num_actions):
    B, obs_dim = x.shape
    obs_pad, hidden_pad = w_fc.shape
    P = w_head.shape[1]
    dt = w_fc.dtype  # static at trace time

    # Pad batch to a sublane multiple so the (B_pad, P) output store is an
    # unmasked vst (8 sublanes for f32 activations, 16 when packed bf16).
    sub = 8 if dt == jnp.float32 else 16
    B_pad = _round_up(max(B, 1), sub)

    # Augment x with the bias ones-column and zero-pad to (B_pad, obs_pad).
    # All of this fuses inside the jit; padded rows are all-zero (harmless).
    x_aug = jnp.concatenate([x.astype(dt), jnp.ones((B, 1), dt)], axis=1)
    x_aug = jnp.pad(x_aug, ((0, B_pad - B), (0, obs_pad - (obs_dim + 1))))

    itemsize = jnp.dtype(dt).itemsize
    cost = pl.CostEstimate(
        flops=2 * B_pad * (obs_pad * hidden_pad + hidden_pad * P),
        transcendentals=B_pad * P,
        bytes_accessed=(B_pad * obs_pad + obs_pad * hidden_pad
                        + hidden_pad * P) * itemsize + B_pad * P * 4,
    )

    # Single gridless invocation: everything fits in VMEM at these sizes, a
    # grid would be pure per-step overhead.
    # TODO(synk): for production batches on v7x add a batch grid
    # (block ~(256, obs_pad), dimension_semantics=("parallel",), weight
    # index_maps returning (0, 0)) to use both TensorCores, and re-budget block
    # sizes / vmem_limit_bytes for the 64 MiB VMEM.
    out = pl.pallas_call(
        functools.partial(actor_critic_kernel, num_actions=num_actions),
        out_shape=jax.ShapeDtypeStruct((B_pad, P), jnp.float32),
        in_specs=[pl.BlockSpec(memory_space=pltpu.MemorySpace.VMEM)] * 3,
        out_specs=pl.BlockSpec(memory_space=pltpu.MemorySpace.VMEM),
        cost_estimate=cost,
    )(x_aug, w_fc, w_head)

    # Slices stay inside the jit -> no eager post-kernel dispatches.
    probs = out[:B, :num_actions]
    value = out[:B, num_actions:num_actions + 1]
    return probs, value


def actor_critic_forward(x, kparams):
    """x: (B, obs_dim); kparams: output of prepare_params."""
    return _forward(x, kparams["w_fc"], kparams["w_head"],
                    num_actions=kparams["num_actions"])


def init_params(key, obs_dim, hidden_dim, num_actions):
    """Deterministic synthetic init, PyTorch nn.Linear shape convention (out, in)."""
    ks = jax.random.split(key, 6)

    def lin(kw, kb, fan_in, fan_out):
        bound = 1.0 / jnp.sqrt(fan_in)
        w = jax.random.uniform(kw, (fan_out, fan_in), jnp.float32, -bound, bound)
        b = jax.random.uniform(kb, (fan_out,), jnp.float32, -bound, bound)
        return w, b

    fc_w, fc_b = lin(ks[0], ks[1], obs_dim, hidden_dim)
    a_w, a_b = lin(ks[2], ks[3], hidden_dim, num_actions)
    c_w, c_b = lin(ks[4], ks[5], hidden_dim, 1)
    return {"fc_w": fc_w, "fc_b": fc_b,
            "actor_w": a_w, "actor_b": a_b,
            "critic_w": c_w, "critic_b": c_b}


def reference_forward(x, params):
    h = jnp.maximum(x @ params["fc_w"].T + params["fc_b"], 0.0)
    logits = h @ params["actor_w"].T + params["actor_b"]
    probs = jax.nn.softmax(logits, axis=-1)
    value = h @ params["critic_w"].T + params["critic_b"]
    return probs, value


if __name__ == "__main__":
    obs_dim, hidden_dim, num_actions, batch = 32, 64, 8, 8

    key = jax.random.PRNGKey(0)
    kx, kp = jax.random.split(key)
    x = jax.random.normal(kx, (batch, obs_dim), jnp.float32)
    params = init_params(kp, obs_dim, hidden_dim, num_actions)
    ref_probs, ref_value = reference_forward(x, params)

    # --- f32 MXU-operand path: strict correctness check ---------------------
    kparams_f32 = prepare_params(params, use_bf16=False)
    probs, value = jax.block_until_ready(actor_critic_forward(x, kparams_f32))
    assert probs.shape == (batch, num_actions) and value.shape == (batch, 1)
    assert jnp.allclose(probs, ref_probs, atol=1e-5, rtol=1e-5)
    assert jnp.allclose(value, ref_value, atol=1e-5, rtol=1e-5)
    assert jnp.allclose(jnp.sum(probs, axis=-1), 1.0, atol=1e-5)

    # --- bf16 MXU-operand path (production flag): looser tolerance ----------
    kparams_bf16 = prepare_params(params, use_bf16=True)
    probs_b, value_b = jax.block_until_ready(actor_critic_forward(x, kparams_bf16))
    assert probs_b.shape == (batch, num_actions) and value_b.shape == (batch, 1)
    assert jnp.allclose(probs_b, ref_probs, atol=8e-2, rtol=5e-2)
    assert jnp.allclose(value_b, ref_value, atol=8e-2, rtol=5e-2)
    assert jnp.allclose(jnp.sum(probs_b, axis=-1), 1.0, atol=1e-5)

    print("KERNEL_OK")
</pallas_src>

<mosaic_0001>
module attributes {stable_mosaic.version = 11 : i64} {
  func.func @actor_critic_kernel(%arg0: memref<8x128xf32, #tpu.memory_space<vmem>>, %arg1: memref<128x128xf32, #tpu.memory_space<vmem>>, %arg2: memref<128x128xf32, #tpu.memory_space<vmem>>, %arg3: memref<8x128xf32, #tpu.memory_space<vmem>>) attributes {dimension_semantics = [], scalar_prefetch = 0 : i64, scratch_operands = 0 : i64, tpu.core_type = #tpu.core_type<tc>} {
    %c0 = arith.constant 0 : index
    %c0_0 = arith.constant 0 : index
    %0 = vector.load %arg0[%c0, %c0_0] : memref<8x128xf32, #tpu.memory_space<vmem>>, vector<8x128xf32>
    %c0_1 = arith.constant 0 : index
    %c0_2 = arith.constant 0 : index
    %1 = vector.load %arg1[%c0_1, %c0_2] : memref<128x128xf32, #tpu.memory_space<vmem>>, vector<128x128xf32>
    %cst = arith.constant dense<0.000000e+00> : vector<8x128xf32>
    %2 = tpu.matmul %0, %1, %cst {dimension_numbers = #tpu.dot_dimension_numbers<[1], [0], [0], [1], [0, 0, 1, 1], [], []>} : vector<8x128xf32>, vector<128x128xf32>, vector<8x128xf32> -> vector<8x128xf32>
    %cst_3 = arith.constant 0.000000e+00 : f32
    %3 = vector.broadcast %cst_3 : f32 to vector<8x128xf32>
    %4 = arith.maximumf %2, %3 : vector<8x128xf32>
    %c0_4 = arith.constant 0 : index
    %c0_5 = arith.constant 0 : index
    %5 = vector.load %arg2[%c0_4, %c0_5] : memref<128x128xf32, #tpu.memory_space<vmem>>, vector<128x128xf32>
    %cst_6 = arith.constant dense<0.000000e+00> : vector<8x128xf32>
    %6 = tpu.matmul %4, %5, %cst_6 {dimension_numbers = #tpu.dot_dimension_numbers<[1], [0], [0], [1], [0, 0, 1, 1], [], []>} : vector<8x128xf32>, vector<128x128xf32>, vector<8x128xf32> -> vector<8x128xf32>
    %7 = tpu.iota {dimensions = array<i32: 1>} : vector<8x128xi32>
    %c8_i32 = arith.constant 8 : i32
    %8 = vector.broadcast %c8_i32 : i32 to vector<8x128xi32>
    %9 = arith.cmpi slt, %7, %8 : vector<8x128xi32>
    %cst_7 = arith.constant 0xFF800000 : f32
    %10 = vector.broadcast %cst_7 : f32 to vector<8x128xf32>
    %11 = arith.select %9, %6, %10 : vector<8x128xi1>, vector<8x128xf32>
    %cst_8 = arith.constant dense<0xFF800000> : vector<8xf32>
    %12 = vector.multi_reduction <maximumf>, %11, %cst_8 [1] : vector<8x128xf32> to vector<8xf32>
    %13 = vector.shape_cast %12 : vector<8xf32> to vector<8x1xf32>
    %14 = vector.broadcast %13 : vector<8x1xf32> to vector<8x128xf32>
    %15 = arith.subf %6, %14 : vector<8x128xf32>
    %cst_9 = arith.constant 0xFF800000 : f32
    %16 = vector.broadcast %cst_9 : f32 to vector<8x128xf32>
    %17 = arith.select %9, %15, %16 : vector<8x128xi1>, vector<8x128xf32>
    %18 = math.exp %17 : vector<8x128xf32>
    %cst_10 = arith.constant dense<0.000000e+00> : vector<8xf32>
    %19 = vector.multi_reduction <add>, %18, %cst_10 [1] : vector<8x128xf32> to vector<8xf32>
    %20 = vector.shape_cast %19 : vector<8xf32> to vector<8x1xf32>
    %21 = tpu.reciprocal %20 : vector<8x1xf32> -> vector<8x1xf32>
    %22 = vector.broadcast %21 : vector<8x1xf32> to vector<8x128xf32>
    %23 = arith.mulf %18, %22 : vector<8x128xf32>
    %c8_i32_11 = arith.constant 8 : i32
    %24 = vector.broadcast %c8_i32_11 : i32 to vector<8x128xi32>
    %25 = arith.cmpi eq, %7, %24 : vector<8x128xi32>
    %cst_12 = arith.constant 0.000000e+00 : f32
    %26 = vector.broadcast %cst_12 : f32 to vector<8x128xf32>
    %27 = arith.select %25, %6, %26 : vector<8x128xi1>, vector<8x128xf32>
    %28 = arith.select %9, %23, %27 : vector<8x128xi1>, vector<8x128xf32>
    %c0_13 = arith.constant 0 : index
    %c0_14 = arith.constant 0 : index
    %29 = vector.load %arg3[%c0_13, %c0_14] : memref<8x128xf32, #tpu.memory_space<vmem>>, vector<8x128xf32>
    tpu.vector_store %arg3[%c0_13, %c0_14], %28 {strides = array<i32>} : memref<8x128xf32, #tpu.memory_space<vmem>>, vector<8x128xf32>,
    return
  }
}

</mosaic_0001>

<bundles_post_ra>
// kernel: _forward.1
= control target key start
LH: loop header
LB: loop body
LE: loop exit
PB: predicated region body
PF: predicated region fallthrough
CT: control target
= control target key end

     0   :  { %8 = vsyncpa [#allocation3], 0  ;;  %s527_s0 = inlined_call_operand.vmem [shape: f32[8,128], index: 0, kind: input, shape index: {}]   ;;  %s528_s1 = inlined_call_operand.hbm [shape: f32[128,128], index: 1, kind: input, shape index: {}]   ;;  %s529_s2 = inlined_call_operand.hbm [shape: f32[128,128], index: 2, kind: input, shape index: {}]   ;;  %s530_s3 = inlined_call_operand.vmem [shape: f32[8,128], index: 3, kind: output, shape index: {}]  }
   0x1   :  { %9 = vsyncpa [#allocation5], 0  ;;  %s451_s12 = smov [#allocation2]   ;;  %s403_s16 = scalar_lea.hbm %s528_s1, 2048 }
   0x2   :  { %s17_s13 = sshll.u32 %s451_s12, 4  ;;  %p404_p0 = scmp.ne.s32.totalorder %s528_s1, %s403_s16  ;;  %s18_s13 = int_to_ptr.vmem [resolvable:$true] %s17_s13 }
   0x3   :  { %p407_p1 = scmp.lt.u32.totalorder %s403_s16, %s528_s1 }
   0x5   :  { %p409_p2 = pnand %p407_p1, %p404_p0 }
   0x7   :  { %412 = shalt.err (!%p409_p2)
}
   0x8   :  { %s413_s21 = scalar_lea.vmem %s18_s13, 2048  ;;  %p418_p4 = scmp.lt.s32.totalorder %s18_s13, %s18_s13 }
   0x9   :  { %p414_p3 = scmp.ne.s32.totalorder %s18_s13, %s413_s21  ;;  %p419_p5 = scmp.lt.s32.totalorder %s413_s21, %s413_s21 }
   0xb   :  { %p420_p6 = por %p419_p5, %p418_p4 }
   0xd   :  { %p421_p7 = pnand %p420_p6, %p414_p3 }
   0xf   :  { %424 = shalt.err (!%p421_p7)
}
  0x10   :  { %s452_s22 = smov 128   ;;  %s453_s23 = smov 8  }
  0x11   :  { %23 = dma.hbm_to_vmem [thread:$0]  %s528_s1, 2048, %s18_s13, [#allocation3], %s452_s22, %s452_s22, %s453_s23  }
  0x12   :  { %s454_s26 = smov [#allocation4]   ;;  %s425_s30 = scalar_lea.hbm %s529_s2, 2048 }
  0x13   :  { %s29_s27 = sshll.u32 %s454_s26, 4  ;;  %p426_p8 = scmp.ne.s32.totalorder %s529_s2, %s425_s30  ;;  %s30_s27 = int_to_ptr.vmem [resolvable:$true] %s29_s27 }
  0x14   :  { %p429_p9 = scmp.lt.u32.totalorder %s425_s30, %s529_s2 }
  0x16   :  { %p431_p10 = pnand %p429_p9, %p426_p8 }
  0x18   :  { %434 = shalt.err (!%p431_p10)
}
  0x19   :  { %s435_s8 = scalar_lea.vmem %s30_s27, 2048  ;;  %p440_p12 = scmp.lt.s32.totalorder %s30_s27, %s30_s27 }
  0x1a   :  { %p436_p11 = scmp.ne.s32.totalorder %s30_s27, %s435_s8  ;;  %p441_p13 = scmp.lt.s32.totalorder %s435_s8, %s435_s8 }
  0x1c   :  { %p442_p0 = por %p441_p13, %p440_p12 }
  0x1e   :  { %p443_p1 = pnand %p442_p0, %p436_p11 }
  0x20   :  { %446 = shalt.err (!%p443_p1)
}
  0x21   :  { %35 = dma.hbm_to_vmem [thread:$0]  %s529_s2, 2048, %s30_s27, [#allocation5], %s452_s22, %s452_s22, %s453_s23  }
  0x22   :  { %447 = dma.done.wait [#allocation3], 2048  }
  0x23   :  { %448 = vsyncadd [#allocation3], 4294965248 }
  0x24   :  { %449 = dma.done.wait [#allocation5], 2048  }
  0x25   :  { %450 = vsyncadd [#allocation5], 4294965248  ;;  %v455_v0 = vmov 0.0|0.0   ;;  %vm456_vm0 = vmmov 0   ;;  %v457_v1 = vmov 0.0   ;;  %v43_v2 = vld [vmem:[#allocation2] sm:$0xff]  ;;  %v216_v54 = vlaneseq }
  0x26   :  { %344 = vmatprep.subr.bf16.mxu0 %v455_v0  ;;  %306 = vmatprep.mubr.msk.f32.mxu0 %vm456_vm0, %v457_v1  ;;  %v44_v3 = vld [vmem:[#allocation2 + $0x8] sm:$0xff]  ;;  %v45_v4 = vld [vmem:[#allocation2 + $0x10] sm:$0xff]  ;;  %v46_v6 = vld [vmem:[#allocation2 + $0x18] sm:$0xff] }
  0x27   :  { %368 = vmatprep.subr.bf16.mxu1 %v455_v0  ;;  %341 = vmatprep.mubr.msk.f32.mxu1 %vm456_vm0, %v457_v1  ;;  %v345_v5 = vpack.c.bf16 %v44_v3, %v43_v2  ;;  %v348_v7 = vpack.c.bf16 %v46_v6, %v45_v4  ;;  %v47_v8 = vld [vmem:[#allocation2 + $0x20] sm:$0xff]  ;;  %v48_v9 = vld [vmem:[#allocation2 + $0x28] sm:$0xff]  ;;  %v132_v12 = vld [vmem:[#allocation4 + $0x10] sm:$0xff]  ;;  %v217_v55 = vand.u32 127, %v216_v54 }
  0x28   :  { %v130_v10 = vld [vmem:[#allocation4] sm:$0xff]  ;;  %v131_v11 = vld [vmem:[#allocation4 + $0x8] sm:$0xff]  ;;  %v133_v13 = vld [vmem:[#allocation4 + $0x18] sm:$0xff]  ;;  %v351_v14 = vpack.c.bf16 %v48_v9, %v47_v8 }
  0x29   :  { %346 = vmatpush3.bf16.msra.mxu0 %v345_v5  ;;  %v369_v15 = vpack.c.bf16 %v131_v11, %v130_v10  ;;  %v49_v16 = vld [vmem:[#allocation2 + $0x30] sm:$0xff]  ;;  %v50_v17 = vld [vmem:[#allocation2 + $0x38] sm:$0xff]  ;;  %v372_v18 = vpack.c.bf16 %v133_v13, %v132_v12  ;;  %v134_v19 = vld [vmem:[#allocation4 + $0x20] sm:$0xff]  ;;  %vm230_vm1 = vcmp.eq.s32.totalorder %v217_v55, 8  ;;  %vm218_vm2 = vcmp.lt.s32.totalorder %v217_v55, 8 }
  0x2a   :  { %347 = vmatprep.subr.bf16.mxu0 %v455_v0  ;;  %v135_v20 = vld [vmem:[#allocation4 + $0x28] sm:$0xff]  ;;  %v354_v21 = vpack.c.bf16 %v50_v17, %v49_v16  ;;  %v51_v22 = vld [vmem:[#allocation2 + $0x40] sm:$0xff]  ;;  %v136_v25 = vld [vmem:[#allocation4 + $0x30] sm:$0xff] }
  0x2b   :  { %370 = vmatpush3.bf16.msra.mxu1 %v369_v15  ;;  %v52_v23 = vld [vmem:[#allocation2 + $0x48] sm:$0xff]  ;;  %v375_v24 = vpack.c.bf16 %v135_v20, %v134_v19  ;;  %v137_v26 = vld [vmem:[#allocation4 + $0x38] sm:$0xff]  ;;  %v53_v28 = vld [vmem:[#allocation2 + $0x50] sm:$0xff] }
  0x2c   :  { %371 = vmatprep.subr.bf16.mxu1 %v455_v0  ;;  %v357_v27 = vpack.c.bf16 %v52_v23, %v51_v22  ;;  %v54_v29 = vld [vmem:[#allocation2 + $0x58] sm:$0xff]  ;;  %v378_v30 = vpack.c.bf16 %v137_v26, %v136_v25  ;;  %v138_v31 = vld [vmem:[#allocation4 + $0x40] sm:$0xff]  ;;  %v139_v32 = vld [vmem:[#allocation4 + $0x48] sm:$0xff] }
  0x2d   :  { %349 = vmatpush3.bf16.msra.mxu0 %v348_v7  ;;  %v360_v33 = vpack.c.bf16 %v54_v29, %v53_v28  ;;  %v55_v34 = vld [vmem:[#allocation2 + $0x60] sm:$0xff]  ;;  %v56_v35 = vld [vmem:[#allocation2 + $0x68] sm:$0xff]  ;;  %v381_v36 = vpack.c.bf16 %v139_v32, %v138_v31  ;;  %v140_v37 = vld [vmem:[#allocation4 + $0x50] sm:$0xff] }
  0x2e   :  { %350 = vmatprep.subr.bf16.mxu0 %v455_v0  ;;  %v141_v38 = vld [vmem:[#allocation4 + $0x58] sm:$0xff]  ;;  %v363_v39 = vpack.c.bf16 %v56_v35, %v55_v34  ;;  %v57_v40 = vld [vmem:[#allocation2 + $0x70] sm:$0xff]  ;;  %v142_v43 = vld [vmem:[#allocation4 + $0x60] sm:$0xff] }
  0x2f   :  { %373 = vmatpush3.bf16.msra.mxu1 %v372_v18  ;;  %v58_v41 = vld [vmem:[#allocation2 + $0x78] sm:$0xff]  ;;  %v384_v42 = vpack.c.bf16 %v141_v38, %v140_v37  ;;  %v143_v44 = vld [vmem:[#allocation4 + $0x68] sm:$0xff]  ;;  %v42_v47 = vld [vmem:[%s527_s0] sm:$0xff] }
  0x30   :  { %374 = vmatprep.subr.bf16.mxu1 %v455_v0  ;;  %v366_v45 = vpack.c.bf16 %v58_v41, %v57_v40  ;;  %v387_v46 = vpack.c.bf16 %v143_v44, %v142_v43  ;;  %v144_v48 = vld [vmem:[#allocation4 + $0x70] sm:$0xff]  ;;  %v145_v49 = vld [vmem:[#allocation4 + $0x78] sm:$0xff] }
  0x31   :  { %352 = vmatpush3.bf16.msra.mxu0 %v351_v14  ;;  %v390_v50 = vpack.c.bf16 %v145_v49, %v144_v48 }
  0x32   :  { %353 = vmatprep.subr.bf16.mxu0 %v455_v0 }
  0x33   :  { %376 = vmatpush3.bf16.msra.mxu1 %v375_v24 }
  0x34   :  { %377 = vmatprep.subr.bf16.mxu1 %v455_v0 }
  0x35   :  { %355 = vmatpush3.bf16.msra.mxu0 %v354_v21 }
  0x36   :  { %356 = vmatprep.subr.bf16.mxu0 %v455_v0 }
  0x37   :  { %379 = vmatpush3.bf16.msra.mxu1 %v378_v30 }
  0x38   :  { %380 = vmatprep.subr.bf16.mxu1 %v455_v0 }
  0x39   :  { %358 = vmatpush3.bf16.msra.mxu0 %v357_v27 }
  0x3a   :  { %359 = vmatprep.subr.bf16.mxu0 %v455_v0 }
  0x3b   :  { %382 = vmatpush3.bf16.msra.mxu1 %v381_v36 }
  0x3c   :  { %383 = vmatprep.subr.bf16.mxu1 %v455_v0 }
  0x3d   :  { %361 = vmatpush3.bf16.msra.mxu0 %v360_v33 }
  0x3e   :  { %362 = vmatprep.subr.bf16.mxu0 %v455_v0 }
  0x3f   :  { %385 = vmatpush3.bf16.msra.mxu1 %v384_v42 }
  0x40   :  { %386 = vmatprep.subr.bf16.mxu1 %v455_v0 }
  0x41   :  { %364 = vmatpush3.bf16.msra.mxu0 %v363_v39 }
  0x42   :  { %365 = vmatprep.subr.bf16.mxu0 %v455_v0 }
  0x43   :  { %388 = vmatpush3.bf16.msra.mxu1 %v387_v46 }
  0x44   :  { %389 = vmatprep.subr.bf16.mxu1 %v455_v0 }
  0x45   :  { %367 = vmatpush3.bf16.msra.mxu0 %v366_v45 }
  0x47   :  { %391 = vmatpush3.bf16.msra.mxu1 %v390_v50 }
  0x48   :  { %307 = vmatmul.mubr.f32.vlgmr.msra.gmra.mrb[0].mxu0 %v42_v47 }
 0x11b   :  { %v125_v51 = vpop.f32.mrb[0].mxu0 }
 0x11c   :  { %v129_v52 = vmax.f32 %v125_v51, 0.0  ;;  %v308_v53 = vpop.f32.mrb[1].mxu0 }
 0x11e   :  { %342 = vmatmul.mubr.f32.vlgmr.msra.gmra.mrb[0].mxu1 %v129_v52 }
 0x1f1   :  { %v212_v56 = vpop.f32.mrb[0].mxu1 }
 0x1f2   :  { %v231_v57 = vsel %vm230_vm1, %v212_v56, 0.0  ;;  %v343_v58 = vpop.f32.mrb[1].mxu1  ;;  %v219_v59 = vsel %vm218_vm2, %v212_v56, -inf }
 0x1f3   :  { %220 = vmax.xlane.f32.xlu0 %v219_v59 }
 0x280   :  { %v221_v60 = vpop.xlane.xlu0 %220 }
 0x281   :  { %v222_v61 = vsub.f32 %v212_v56, %v221_v60 }
 0x283   :  { %v223_v62 = vsel %vm218_vm2, %v222_v61, -inf }
 0x284   :  { %v224_v63 = vmul.f32 1.442695, %v223_v62 }
 0x286   :  { %399 = vpow2.f32 %v224_v63 }
 0x290   :  { %v400_v0 = vpop.eup %399 }
 0x291   :  { %226 = vadd.xlane.f32.xlu0 %v400_v0 }
 0x31e   :  { %v227_v1 = vpop.xlane.xlu0 %226 }
 0x31f   :  { %401 = vrcp.f32 %v227_v1 }
 0x329   :  { %v402_v2 = vpop.eup %401 }
 0x32a   :  { %v229_v3 = vmul.f32 %v402_v2, %v400_v0 }
 0x32c   :  { %v232_v4 = vsel %vm218_vm2, %v229_v3, %v231_v57 }
 0x32d   :  { %233 = vst [vmem:[%s530_s3] sm:$0xff] %v232_v4 }
 0x32e   :  { %238 = vsyncpa [#allocation3], 1 }
 0x32f   :  { %239 = vsyncpa [#allocation5], 1 }

</bundles_post_ra>
